<compile_context>
chip_gen: v6e
topology: v6e:2x2x1
jax: 0.10.0
libtpu: 0.0.40
codegen_flags: <defaults>
</compile_context>

<pallas_src>
import functools

import jax
import jax.numpy as jnp
import numpy as np
from jax.experimental import pallas as pl
from jax.experimental.pallas import tpu as pltpu


_LANE = 128     # padded feature width (all layer dims here are <= 128)
_SUBLANE = 8


def _round_up(a, b):
    return ((a + b - 1) // b) * b


def _make_fused_mlp_kernel(num_layers: int):
    """Fused MLP kernel over padded P=128 features.

    Refs: x_ref (TM, P) bf16, w_ref (L, P, P) bf16, b_ref (L, 8, P) f32
          (real bias in sublane 0, zeros elsewhere), o_ref (TM, P) f32.
    """

    def kernel(x_ref, w_ref, b_ref, o_ref):
        h = x_ref[...]                      # (TM, P) bf16
        for l in range(num_layers):         # static unroll (L is small)
            w = w_ref[l]                    # (P, P) bf16
            b = b_ref[l][0:1, :]            # (1, P) f32, broadcasts over rows
            y = jnp.dot(h, w, preferred_element_type=jnp.float32) + b
            if l < num_layers - 1:
                y = jnp.maximum(y, 0.0)
                h = y.astype(jnp.bfloat16)  # carry hidden activations in bf16
            else:
                h = y                       # last layer stays f32
        o_ref[...] = h                      # lane-dense (TM, 128) f32 store

    return kernel


def fused_mlp_forward(x, w_slab, b_slab, out_dim, *, max_row_tile=1024):
    """Run the whole MLP in one pallas_call.

    x:      (M, K) f32 or bf16 input (K <= 128).
    w_slab: (L, P, P) bf16 zero-padded weights.
    b_slab: (L, 8, P) f32 biases in sublane 0, zeros elsewhere.
    Returns (M, out_dim) f32.
    """
    M, K = x.shape
    num_layers = w_slab.shape[0]
    P = w_slab.shape[-1]

    # Row tile: whole batch if it fits (grid=(1,)), else <=1024-row tiles.
    tm = min(_round_up(max_row_tile, _SUBLANE), _round_up(M, _SUBLANE))
    m_pad = _round_up(M, tm)
    n_row_tiles = m_pad // tm

    # Cast once + zero-pad rows/lanes in the wrapper (single HBM copy; at
    # these sizes it is negligible, and it makes every kernel store unmasked).
    x_pad = jnp.pad(x.astype(jnp.bfloat16), ((0, m_pad - M), (0, P - K)))

    kernel = _make_fused_mlp_kernel(num_layers)

    in_specs = [
        pl.BlockSpec((tm, P), lambda i: (i, 0)),                      # x tile
        # Grid-invariant parameter slabs: one DMA each.  With grid=(1,) the
        # default double-buffering is moot; memory footprint is ~100 KB.
        pl.BlockSpec((num_layers, P, P), lambda i: (0, 0, 0)),        # weights
        pl.BlockSpec((num_layers, _SUBLANE, P), lambda i: (0, 0, 0)), # biases
    ]
    out_spec = pl.BlockSpec((tm, P), lambda i: (i, 0))

    flops = 2 * m_pad * num_layers * P * P
    bytes_accessed = (x_pad.size * 2 + w_slab.size * 2 + b_slab.size * 4
                      + m_pad * P * 4)

    out = pl.pallas_call(
        kernel,
        out_shape=jax.ShapeDtypeStruct((m_pad, P), jnp.float32),
        grid=(n_row_tiles,),
        in_specs=in_specs,
        out_specs=out_spec,
        compiler_params=pltpu.CompilerParams(
            dimension_semantics=("parallel",)),   # megacore sharding when >1 tile
        cost_estimate=pl.CostEstimate(
            flops=flops, transcendentals=0, bytes_accessed=bytes_accessed),
    )(x_pad, w_slab, b_slab)

    return out[:M, :out_dim]


class ModelNetworkPallas:
    """JAX/Pallas port of ModelNetwork (concrete MLP forward, fused kernel)."""

    def __init__(self, params, key):
        self.params = params
        self.layer_dimensions = (
            [params["input_dimension"]]
            + params["network_layers"]
            + [params["output_dimension"]]
        )
        self.weights = []   # f32 masters (reference semantics)
        self.biases = []    # f32 (1, fan_out)
        self._construct_layers(key)
        self._pack_params()

    def _construct_layers(self, key):
        # Mirrors _reset_parameters: uniform(-std, std), std = 1/sqrt(fan_in)
        for l in range(len(self.layer_dimensions) - 1):
            fan_in = self.layer_dimensions[l]
            fan_out = self.layer_dimensions[l + 1]
            std = 1.0 / np.sqrt(fan_in)
            key, kw, kb = jax.random.split(key, 3)
            w = jax.random.uniform(
                kw, (fan_in, fan_out), jnp.float32, minval=-std, maxval=std)
            b = jax.random.uniform(
                kb, (1, fan_out), jnp.float32, minval=-std, maxval=std)
            self.weights.append(w)
            self.biases.append(b)

    def _pack_params(self):
        """Pack all layers into one zero-padded bf16 weight slab + f32 bias slab."""
        L = len(self.weights)
        P = _round_up(max(self.layer_dimensions), _LANE)
        w_slab = np.zeros((L, P, P), dtype=np.float32)
        b_slab = np.zeros((L, _SUBLANE, P), dtype=np.float32)
        for l, (w, b) in enumerate(zip(self.weights, self.biases)):
            fi, fo = w.shape
            w_slab[l, :fi, :fo] = np.asarray(w)
            b_slab[l, 0, :fo] = np.asarray(b)[0]
        self.w_slab = jnp.asarray(w_slab).astype(jnp.bfloat16)
        self.b_slab = jnp.asarray(b_slab)
        self.padded_dim = P

    def forward(self, x):
        return fused_mlp_forward(
            x, self.w_slab, self.b_slab, self.layer_dimensions[-1])

    def forward_reference_bf16(self, x):
        # Pure-JAX reference mimicking the kernel math (bf16 operands,
        # f32 accumulation, bf16 hidden activations).
        h = x.astype(jnp.bfloat16)
        n = len(self.weights)
        for l in range(n):
            y = jnp.dot(h, self.weights[l].astype(jnp.bfloat16),
                        preferred_element_type=jnp.float32) + self.biases[l]
            if l < n - 1:
                y = jnp.maximum(y, 0.0)
                h = y.astype(jnp.bfloat16)
            else:
                h = y
        return h

    def forward_reference_f32(self, x):
        # Full-precision reference (original torch module semantics).
        h = x
        n = len(self.weights)
        for l in range(n):
            h = h @ self.weights[l] + self.biases[l]
            if l < n - 1:
                h = jnp.maximum(h, 0.0)
        return h


if __name__ == "__main__":
    params = {
        "device": "tpu",
        "input_dimension": 16,
        "network_layers": [32, 32],
        "output_dimension": 8,
    }

    key = jax.random.PRNGKey(0)
    key, kx = jax.random.split(key)

    # Stack the MAML meta-batch into one matrix: 64 tasks x 4 samples/task =
    # 256 rows -> a single 256-row tile, grid=(1,).
    num_tasks, task_batch = 64, 4
    batch_rows = num_tasks * task_batch
    x = jax.random.normal(kx, (batch_rows, params["input_dimension"]), jnp.float32)

    net = ModelNetworkPallas(params, key)

    out = net.forward(x)
    out = jax.block_until_ready(out)
    assert out.shape == (batch_rows, params["output_dimension"])

    # Exact-math check against a reference using the same bf16/f32 path.
    ref_bf16 = net.forward_reference_bf16(x)
    np.testing.assert_allclose(np.asarray(out), np.asarray(ref_bf16),
                               rtol=1e-5, atol=1e-5)

    # Semantics check against the original full-f32 module math (loose tol
    # because matmul operands are bf16 on the MXU).
    ref_f32 = net.forward_reference_f32(x)
    np.testing.assert_allclose(np.asarray(out), np.asarray(ref_f32),
                               rtol=5e-2, atol=5e-2)

    print("KERNEL_OK")
</pallas_src>

<mosaic_0001>
module attributes {stable_mosaic.version = 11 : i64} {
  func.func @kernel(%arg0: i32, %arg1: memref<256x128xbf16, #tpu.memory_space<vmem>>, %arg2: memref<3x128x128xbf16, #tpu.memory_space<vmem>>, %arg3: memref<3x8x128xf32, #tpu.memory_space<vmem>>, %arg4: memref<256x128xf32, #tpu.memory_space<vmem>>) attributes {dimension_semantics = [#tpu.dimension_semantics<parallel>], iteration_bounds = array<i64: 1>, scalar_prefetch = 0 : i64, scratch_operands = 0 : i64, tpu.core_type = #tpu.core_type<tc>, window_params = [{transform_indices = @transform_0, window_bounds = array<i64: 256, 128>}, {pipeline_mode = #tpu.pipeline_mode<synchronous>, transform_indices = @transform_1, window_bounds = array<i64: 3, 128, 128>}, {pipeline_mode = #tpu.pipeline_mode<synchronous>, transform_indices = @transform_2, window_bounds = array<i64: 3, 8, 128>}, {transform_indices = @transform_3, window_bounds = array<i64: 256, 128>}]} {
    %c0 = arith.constant 0 : index
    %c0_0 = arith.constant 0 : index
    %0 = vector.load %arg1[%c0, %c0_0] : memref<256x128xbf16, #tpu.memory_space<vmem>>, vector<256x128xbf16>
    %c0_1 = arith.constant 0 : index
    %c0_2 = arith.constant 0 : index
    %c0_3 = arith.constant 0 : index
    %1 = vector.load %arg2[%c0_1, %c0_2, %c0_3] : memref<3x128x128xbf16, #tpu.memory_space<vmem>>, vector<1x128x128xbf16>
    %2 = vector.shape_cast %1 : vector<1x128x128xbf16> to vector<128x128xbf16>
    %c0_4 = arith.constant 0 : index
    %c0_5 = arith.constant 0 : index
    %c0_6 = arith.constant 0 : index
    %3 = vector.load %arg3[%c0_4, %c0_5, %c0_6] : memref<3x8x128xf32, #tpu.memory_space<vmem>>, vector<1x8x128xf32>
    %4 = vector.shape_cast %3 : vector<1x8x128xf32> to vector<8x128xf32>
    %5 = vector.extract_strided_slice %4 {offsets = [0, 0], sizes = [1, 128], strides = [1, 1]} : vector<8x128xf32> to vector<1x128xf32>
    %cst = arith.constant dense<0.000000e+00> : vector<256x128xf32>
    %6 = tpu.matmul %0, %2, %cst {dimension_numbers = #tpu.dot_dimension_numbers<[1], [0], [0], [1], [0, 0, 1, 1], [], []>} : vector<256x128xbf16>, vector<128x128xbf16>, vector<256x128xf32> -> vector<256x128xf32>
    %7 = vector.broadcast %5 : vector<1x128xf32> to vector<256x128xf32>
    %8 = arith.addf %6, %7 : vector<256x128xf32>
    %cst_7 = arith.constant 0.000000e+00 : f32
    %9 = vector.broadcast %cst_7 : f32 to vector<256x128xf32>
    %10 = arith.maximumf %8, %9 : vector<256x128xf32>
    %11 = arith.truncf %10 : vector<256x128xf32> to vector<256x128xbf16>
    %c1 = arith.constant 1 : index
    %c0_8 = arith.constant 0 : index
    %c0_9 = arith.constant 0 : index
    %12 = vector.load %arg2[%c1, %c0_8, %c0_9] : memref<3x128x128xbf16, #tpu.memory_space<vmem>>, vector<1x128x128xbf16>
    %13 = vector.shape_cast %12 : vector<1x128x128xbf16> to vector<128x128xbf16>
    %c1_10 = arith.constant 1 : index
    %c0_11 = arith.constant 0 : index
    %c0_12 = arith.constant 0 : index
    %14 = vector.load %arg3[%c1_10, %c0_11, %c0_12] : memref<3x8x128xf32, #tpu.memory_space<vmem>>, vector<1x8x128xf32>
    %15 = vector.shape_cast %14 : vector<1x8x128xf32> to vector<8x128xf32>
    %16 = vector.extract_strided_slice %15 {offsets = [0, 0], sizes = [1, 128], strides = [1, 1]} : vector<8x128xf32> to vector<1x128xf32>
    %cst_13 = arith.constant dense<0.000000e+00> : vector<256x128xf32>
    %17 = tpu.matmul %11, %13, %cst_13 {dimension_numbers = #tpu.dot_dimension_numbers<[1], [0], [0], [1], [0, 0, 1, 1], [], []>} : vector<256x128xbf16>, vector<128x128xbf16>, vector<256x128xf32> -> vector<256x128xf32>
    %18 = vector.broadcast %16 : vector<1x128xf32> to vector<256x128xf32>
    %19 = arith.addf %17, %18 : vector<256x128xf32>
    %cst_14 = arith.constant 0.000000e+00 : f32
    %20 = vector.broadcast %cst_14 : f32 to vector<256x128xf32>
    %21 = arith.maximumf %19, %20 : vector<256x128xf32>
    %22 = arith.truncf %21 : vector<256x128xf32> to vector<256x128xbf16>
    %c2 = arith.constant 2 : index
    %c0_15 = arith.constant 0 : index
    %c0_16 = arith.constant 0 : index
    %23 = vector.load %arg2[%c2, %c0_15, %c0_16] : memref<3x128x128xbf16, #tpu.memory_space<vmem>>, vector<1x128x128xbf16>
    %24 = vector.shape_cast %23 : vector<1x128x128xbf16> to vector<128x128xbf16>
    %c2_17 = arith.constant 2 : index
    %c0_18 = arith.constant 0 : index
    %c0_19 = arith.constant 0 : index
    %25 = vector.load %arg3[%c2_17, %c0_18, %c0_19] : memref<3x8x128xf32, #tpu.memory_space<vmem>>, vector<1x8x128xf32>
    %26 = vector.shape_cast %25 : vector<1x8x128xf32> to vector<8x128xf32>
    %27 = vector.extract_strided_slice %26 {offsets = [0, 0], sizes = [1, 128], strides = [1, 1]} : vector<8x128xf32> to vector<1x128xf32>
    %cst_20 = arith.constant dense<0.000000e+00> : vector<256x128xf32>
    %28 = tpu.matmul %22, %24, %cst_20 {dimension_numbers = #tpu.dot_dimension_numbers<[1], [0], [0], [1], [0, 0, 1, 1], [], []>} : vector<256x128xbf16>, vector<128x128xbf16>, vector<256x128xf32> -> vector<256x128xf32>
    %29 = vector.broadcast %27 : vector<1x128xf32> to vector<256x128xf32>
    %30 = arith.addf %28, %29 : vector<256x128xf32>
    %c0_21 = arith.constant 0 : index
    %c0_22 = arith.constant 0 : index
    %31 = vector.load %arg4[%c0_21, %c0_22] : memref<256x128xf32, #tpu.memory_space<vmem>>, vector<256x128xf32>
    tpu.vector_store %arg4[%c0_21, %c0_22], %30 {strides = array<i32>} : memref<256x128xf32, #tpu.memory_space<vmem>>, vector<256x128xf32>,
    return
  }
  func.func @transform_0(%arg0: i32) -> (i32, i32) {
    %c0_i32 = arith.constant 0 : i32
    %c0_i32_0 = arith.constant 0 : i32
    return %arg0, %c0_i32 : i32, i32
  }
  func.func @transform_1(%arg0: i32) -> (i32, i32, i32) {
    %c0_i32 = arith.constant 0 : i32
    %c0_i32_0 = arith.constant 0 : i32
    %c0_i32_1 = arith.constant 0 : i32
    %c0_i32_2 = arith.constant 0 : i32
    return %c0_i32, %c0_i32_0, %c0_i32_1 : i32, i32, i32
  }
  func.func @transform_2(%arg0: i32) -> (i32, i32, i32) {
    %c0_i32 = arith.constant 0 : i32
    %c0_i32_0 = arith.constant 0 : i32
    %c0_i32_1 = arith.constant 0 : i32
    %c0_i32_2 = arith.constant 0 : i32
    return %c0_i32, %c0_i32_0, %c0_i32_1 : i32, i32, i32
  }
  func.func @transform_3(%arg0: i32) -> (i32, i32) {
    %c0_i32 = arith.constant 0 : i32
    %c0_i32_0 = arith.constant 0 : i32
    return %arg0, %c0_i32 : i32, i32
  }
}

</mosaic_0001>

<bundles_post_ra>
// kernel: tpu_custom_call.1
= control target key start
LH: loop header
LB: loop body
LE: loop exit
PB: predicated region body
PF: predicated region fallthrough
CT: control target
= control target key end

     0   :  { %8 = vsyncpa [#allocation3], 0  ;;  %s1599_s0 = inlined_call_operand.hbm [shape: bf16[256,128], index: 0, kind: input, shape index: {}]   ;;  %s1600_s1 = inlined_call_operand.hbm [shape: bf16[3,128,128], index: 1, kind: input, shape index: {}]   ;;  %s1601_s2 = inlined_call_operand.hbm [shape: f32[3,8,128], index: 2, kind: input, shape index: {}]   ;;  %s1602_s3 = inlined_call_operand.hbm [shape: f32[256,128], index: 3, kind: output, shape index: {}]  }
   0x1   :  { %9 = vsyncpa [#allocation6], 0 }
   0x2   :  { %10 = vsyncpa [#allocation4], 0  ;;  %s1431_s12 = smov [#allocation5]   ;;  %s1432_s14 = smov [#allocation2]  }
   0x3   :  { %s28_s13 = sshll.u32 %s1431_s12, 4  ;;  %s16_s15 = sshll.u32 %s1432_s14, 4  ;;  %s29_s13 = int_to_ptr.vmem [resolvable:$true] %s28_s13  ;;  %s17_s15 = int_to_ptr.vmem [resolvable:$true] %s16_s15 }
   0x4   :  { %s1353_s16 = scalar_lea.vmem %s29_s13, 3072  ;;  %p1358_p1 = scmp.lt.s32.totalorder %s29_s13, %s29_s13 }
   0x5   :  { %p1354_p0 = scmp.ne.s32.totalorder %s29_s13, %s1353_s16  ;;  %p1359_p2 = scmp.lt.s32.totalorder %s1353_s16, %s1353_s16 }
   0x7   :  { %p1360_p3 = por %p1359_p2, %p1358_p1 }
   0x9   :  { %p1361_p4 = pnand %p1360_p3, %p1354_p0 }
   0xb   :  { %1364 = shalt.err (!%p1361_p4)
}
   0xc   :  { %s1433_s17 = smov 64   ;;  %s1434_s18 = smov 4  }
   0xd   :  { %34 = dma.hbm_to_vmem [thread:$0]  %s1600_s1, 3072, %s29_s13, [#allocation6], %s1433_s17, %s1433_s17, %s1434_s18  }
   0xe   :  { %s1373_s21 = scalar_lea.vmem %s17_s15, 2048  ;;  %p1378_p6 = scmp.lt.s32.totalorder %s17_s15, %s17_s15 }
   0xf   :  { %p1374_p5 = scmp.ne.s32.totalorder %s17_s15, %s1373_s21  ;;  %p1379_p7 = scmp.lt.s32.totalorder %s1373_s21, %s1373_s21 }
  0x11   :  { %p1380_p8 = por %p1379_p7, %p1378_p6 }
  0x13   :  { %p1381_p9 = pnand %p1380_p8, %p1374_p5 }
  0x15   :  { %1384 = shalt.err (!%p1381_p9)
}
  0x16   :  { %22 = dma.hbm_to_vmem [thread:$0]  %s1599_s0, 2048, %s17_s15, [#allocation3], %s1433_s17, %s1433_s17, %s1434_s18  }
  0x17   :  { %s1435_s24 = smov [#allocation7]  }
  0x18   :  { %s40_s25 = sshll.u32 %s1435_s24, 4  ;;  %s41_s25 = int_to_ptr.vmem [resolvable:$true] %s40_s25 }
  0x19   :  { %s1393_s26 = scalar_lea.vmem %s41_s25, 384  ;;  %p1398_p11 = scmp.lt.s32.totalorder %s41_s25, %s41_s25 }
  0x1a   :  { %p1394_p10 = scmp.ne.s32.totalorder %s41_s25, %s1393_s26  ;;  %p1399_p12 = scmp.lt.s32.totalorder %s1393_s26, %s1393_s26 }
  0x1c   :  { %p1400_p13 = por %p1399_p12, %p1398_p11 }
  0x1e   :  { %p1401_p0 = pnand %p1400_p13, %p1394_p10 }
  0x20   :  { %1404 = shalt.err (!%p1401_p0)
}
  0x21   :  { %s1436_s1 = smov 128   ;;  %s1437_s27 = smov 8  }
  0x22   :  { %46 = dma.hbm_to_vmem [thread:$0]  %s1601_s2, 384, %s41_s25, [#allocation6], %s1436_s1, %s1436_s1, %s1437_s27  }
  0x23   :  { %1425 = dma.done.wait [#allocation3], 2048  }
  0x24   :  { %1426 = vsyncadd [#allocation3], 4294965248 }
  0x25   :  { %1427 = dma.done.wait [#allocation6], 3456  }
  0x26   :  { %1428 = vsyncadd [#allocation6], 4294963840  ;;  %v1305_v0 = vld [vmem:[#allocation5 + $0x38] sm:$0xff]   ;;  %v1306_v1 = vld [vmem:[#allocation5 + $0x30] sm:$0xff]   ;;  %v106_v37 = vlaneseq  ;;  %s1438_s0 = smov [#allocation8]  }
  0x27   :  { %1137 = vmatprep.subr.bf16.mxu0 %v1305_v0  ;;  %1281 = vmatprep.subr.bf16.mxu1 %v1305_v0  ;;  %v1307_v2 = vld [vmem:[#allocation5 + $0x28] sm:$0xff]   ;;  %v1308_v3 = vld [vmem:[#allocation5 + $0x20] sm:$0xff]   ;;  %v1309_v5 = vld [vmem:[#allocation5 + $0x18] sm:$0xff]   ;;  %s1012_s2 = sshll.u32 %s1438_s0, 4  ;;  %s1013_s2 = int_to_ptr.vmem [resolvable:$true] %s1012_s2 }
  0x28   :  { %1138 = vmatpush3.bf16.msra.mxu0 %v1305_v0  ;;  %1289 = vmatpush3.bf16.msra.mxu1 %v1305_v0  ;;  %v1313_v4 = vld [vmem:[#allocation2] sm:$0xff]   ;;  %v1310_v6 = vld [vmem:[#allocation5 + $0x10] sm:$0xff]   ;;  %v1311_v8 = vld [vmem:[#allocation5 + $0x8] sm:$0xff]   ;;  %v107_v38 = vshrl.u32 %v106_v37, 7  ;;  %s1405_s30 = scalar_lea.vmem %s1013_s2, 4096  ;;  %p1410_p2 = scmp.lt.s32.totalorder %s1013_s2, %s1013_s2 }
  0x29   :  { %1139 = vmatprep.subr.bf16.mxu0 %v1306_v1  ;;  %1282 = vmatprep.subr.bf16.mxu1 %v1306_v1  ;;  %v1321_v7 = vld [vmem:[#allocation2 + $0x40] sm:$0xff]   ;;  %v1314_v10 = vld [vmem:[#allocation2 + $0x8] sm:$0xff]   ;;  %v1329_v12 = vld [vmem:[#allocation5 + $0x78] sm:$0xff]   ;;  %p1406_p1 = scmp.ne.s32.totalorder %s1013_s2, %s1405_s30  ;;  %p1411_p3 = scmp.lt.s32.totalorder %s1405_s30, %s1405_s30 }
  0x2a   :  { %1153 = vmatprep.mubr.bf16.mxu0 %v1313_v4  ;;  %1169 = vmatprep.mubr.bf16.mxu1 %v1321_v7  ;;  %v1312_v9 = vld [vmem:[#allocation5] sm:$0xff]   ;;  %v1322_v11 = vld [vmem:[#allocation2 + $0x48] sm:$0xff]   ;;  %v1315_v13 = vld [vmem:[#allocation2 + $0x10] sm:$0xff]   ;;  %v1471_v39 = vsub.s32 0, %v107_v38 }
  0x2b   :  { %v1323_v14 = vld [vmem:[#allocation2 + $0x50] sm:$0xff]   ;;  %v1331_v16 = vld [vmem:[#allocation5 + $0x68] sm:$0xff]   ;;  %v1316_v17 = vld [vmem:[#allocation2 + $0x18] sm:$0xff]   ;;  %p1412_p4 = por %p1411_p3, %p1410_p2 }
  0x2c   :  { %1140 = vmatpush3.bf16.msra.mxu0 %v1306_v1  ;;  %1290 = vmatpush3.bf16.msra.mxu1 %v1306_v1  ;;  %v1330_v15 = vld [vmem:[#allocation5 + $0x70] sm:$0xff]   ;;  %v1324_v18 = vld [vmem:[#allocation2 + $0x58] sm:$0xff]   ;;  %v1317_v19 = vld [vmem:[#allocation2 + $0x20] sm:$0xff]  }
  0x2d   :  { %1141 = vmatprep.subr.bf16.mxu0 %v1307_v2  ;;  %1283 = vmatprep.subr.bf16.mxu1 %v1307_v2  ;;  %v1325_v20 = vld [vmem:[#allocation2 + $0x60] sm:$0xff]   ;;  %v1333_v22 = vld [vmem:[#allocation5 + $0x58] sm:$0xff]   ;;  %v1318_v23 = vld [vmem:[#allocation2 + $0x28] sm:$0xff]   ;;  %p1413_p5 = pnand %p1412_p4, %p1406_p1 }
  0x2e   :  { %v1332_v21 = vld [vmem:[#allocation5 + $0x60] sm:$0xff]   ;;  %v1326_v24 = vld [vmem:[#allocation2 + $0x68] sm:$0xff]   ;;  %v1319_v25 = vld [vmem:[#allocation2 + $0x30] sm:$0xff]  }
  0x2f   :  { %v1327_v26 = vld [vmem:[#allocation2 + $0x70] sm:$0xff]   ;;  %v1320_v27 = vld [vmem:[#allocation2 + $0x38] sm:$0xff]   ;;  %v1335_v30 = vld [vmem:[#allocation5 + $0x48] sm:$0xff]  }
  0x30   :  { %1142 = vmatpush3.bf16.msra.mxu0 %v1307_v2  ;;  %1291 = vmatpush3.bf16.msra.mxu1 %v1307_v2  ;;  %v1328_v28 = vld [vmem:[#allocation2 + $0x78] sm:$0xff]   ;;  %v1334_v29 = vld [vmem:[#allocation5 + $0x50] sm:$0xff]   ;;  %v1336_v31 = vld [vmem:[#allocation5 + $0x40] sm:$0xff]  }
  0x31   :  { %1143 = vmatprep.subr.bf16.mxu0 %v1308_v3  ;;  %1284 = vmatprep.subr.bf16.mxu1 %v1308_v3  ;;  %v1337_v32 = vld [vmem:[#allocation5 + $0xb8] sm:$0xff]   ;;  %v1338_v33 = vld [vmem:[#allocation5 + $0xb0] sm:$0xff]   ;;  %v1339_v34 = vld [vmem:[#allocation5 + $0xa8] sm:$0xff]  }
  0x32   :  { %v1340_v35 = vld [vmem:[#allocation5 + $0xa0] sm:$0xff]   ;;  %v1341_v36 = vld [vmem:[#allocation5 + $0x98] sm:$0xff]  }
  0x33   :  { %v105_v40 = vld [vmem:[#allocation7] sm:$0xff] }
  0x34   :  { %1144 = vmatpush3.bf16.msra.mxu0 %v1308_v3  ;;  %1292 = vmatpush3.bf16.msra.mxu1 %v1308_v3  ;;  %v1476_v43 = vrot.slane %v105_v40, %v1471_v39 }
  0x35   :  { %1145 = vmatprep.subr.bf16.mxu0 %v1309_v5  ;;  %1285 = vmatprep.subr.bf16.mxu1 %v1309_v5 }
  0x38   :  { %1146 = vmatpush3.bf16.msra.mxu0 %v1309_v5  ;;  %1293 = vmatpush3.bf16.msra.mxu1 %v1309_v5 }
  0x39   :  { %1147 = vmatprep.subr.bf16.mxu0 %v1310_v6  ;;  %1286 = vmatprep.subr.bf16.mxu1 %v1310_v6 }
  0x3c   :  { %1148 = vmatpush3.bf16.msra.mxu0 %v1310_v6  ;;  %1294 = vmatpush3.bf16.msra.mxu1 %v1310_v6 }
  0x3d   :  { %1149 = vmatprep.subr.bf16.mxu0 %v1311_v8  ;;  %1287 = vmatprep.subr.bf16.mxu1 %v1311_v8 }
  0x40   :  { %1150 = vmatpush3.bf16.msra.mxu0 %v1311_v8  ;;  %1295 = vmatpush3.bf16.msra.mxu1 %v1311_v8 }
  0x41   :  { %1151 = vmatprep.subr.bf16.mxu0 %v1312_v9  ;;  %1288 = vmatprep.subr.bf16.mxu1 %v1312_v9 }
  0x44   :  { %1152 = vmatpush3.bf16.msra.mxu0 %v1312_v9  ;;  %1296 = vmatpush3.bf16.msra.mxu1 %v1312_v9 }
  0x45   :  { %1185 = vmatprep.subr.bf16.mxu1 %v1329_v12  ;;  %1233 = vmatprep.subr.bf16.mxu0 %v1337_v32 }
  0x47   :  { %1154 = vmatmul.mubr.bf16.vlgmr.msra.gmra.mxu0 %v1314_v10  ;;  %1170 = vmatmul.mubr.bf16.vlgmr.msra.gmra.mxu1 %v1322_v11 }
  0x48   :  { %1157 = vmatprep.mubr.bf16.mxu0 %v1315_v13  ;;  %1173 = vmatprep.mubr.bf16.mxu1 %v1323_v14 }
  0x49   :  { %1186 = vmatpush3.bf16.msra.mxu1 %v1329_v12  ;;  %1234 = vmatpush3.bf16.msra.mxu0 %v1337_v32 }
  0x4a   :  { %1187 = vmatprep.subr.bf16.mxu1 %v1330_v15  ;;  %1235 = vmatprep.subr.bf16.mxu0 %v1338_v33 }
  0x4d   :  { %1188 = vmatpush3.bf16.msra.mxu1 %v1330_v15  ;;  %1236 = vmatpush3.bf16.msra.mxu0 %v1338_v33 }
  0x4e   :  { %1189 = vmatprep.subr.bf16.mxu1 %v1331_v16  ;;  %1237 = vmatprep.subr.bf16.mxu0 %v1339_v34 }
  0x4f   :  { %1158 = vmatmul.mubr.bf16.gmra.mxu0 %v1316_v17  ;;  %1174 = vmatmul.mubr.bf16.gmra.mxu1 %v1324_v18 }
  0x50   :  { %1161 = vmatprep.mubr.bf16.mxu0 %v1317_v19  ;;  %1177 = vmatprep.mubr.bf16.mxu1 %v1325_v20 }
  0x51   :  { %1190 = vmatpush3.bf16.msra.mxu1 %v1331_v16  ;;  %1238 = vmatpush3.bf16.msra.mxu0 %v1339_v34 }
  0x52   :  { %1191 = vmatprep.subr.bf16.mxu1 %v1332_v21  ;;  %1239 = vmatprep.subr.bf16.mxu0 %v1340_v35 }
  0x55   :  { %1192 = vmatpush3.bf16.msra.mxu1 %v1332_v21  ;;  %1240 = vmatpush3.bf16.msra.mxu0 %v1340_v35 }
  0x56   :  { %1193 = vmatprep.subr.bf16.mxu1 %v1333_v22  ;;  %1241 = vmatprep.subr.bf16.mxu0 %v1341_v36 }
  0x57   :  { %1162 = vmatmul.mubr.bf16.gmra.mxu0 %v1318_v23  ;;  %1178 = vmatmul.mubr.bf16.gmra.mxu1 %v1326_v24 }
  0x58   :  { %1165 = vmatprep.mubr.bf16.mxu0 %v1319_v25  ;;  %1181 = vmatprep.mubr.bf16.mxu1 %v1327_v26 }
  0x59   :  { %1194 = vmatpush3.bf16.msra.mxu1 %v1333_v22  ;;  %1242 = vmatpush3.bf16.msra.mxu0 %v1341_v36 }
  0x5a   :  { %1195 = vmatprep.subr.bf16.mxu1 %v1334_v29 }
  0x5d   :  { %1196 = vmatpush3.bf16.msra.mxu1 %v1334_v29 }
  0x5e   :  { %1197 = vmatprep.subr.bf16.mxu1 %v1335_v30 }
  0x5f   :  { %1166 = vmatmul.mubr.bf16.gmra.mxu0 %v1320_v27  ;;  %1182 = vmatmul.mubr.bf16.gmra.mxu1 %v1328_v28 }
  0x61   :  { %1198 = vmatpush3.bf16.msra.mxu1 %v1335_v30 }
  0x62   :  { %1199 = vmatprep.subr.bf16.mxu1 %v1336_v31 }
  0x65   :  { %1200 = vmatpush3.bf16.msra.mxu1 %v1336_v31 }
 0x107   :  { %v1155_v41 = vpop.f32.mrf.mxu0  ;;  %v1473_v42 = vpop.f32.mrf.mxu1 }
 0x108   :  { %v297_v50 = vadd.f32 %v1155_v41, %v1476_v43 }
 0x109   :  { %v288_v44 = vpop.f32.mrf.mxu0  ;;  %v352_v45 = vpop.f32.mrf.mxu1 }
 0x10a   :  { %v289_v48 = vadd.f32 %v288_v44, %v1476_v43  ;;  %v417_v59 = vmax.f32 %v297_v50, 0.0  ;;  %v353_v31 = vadd.f32 %v352_v45, %v1476_v43 }
 0x10b   :  { %v1156_v46 = vpop.f32.mrf.mxu0  ;;  %v1478_v47 = vpop.f32.mrf.mxu1 }
 0x10c   :  { %v300_v49 = vadd.f32 %v1156_v46, %v1476_v43  ;;  %v415_v57 = vmax.f32 %v289_v48, 0.0  ;;  %v431_v41 = vmax.f32 %v353_v31, 0.0  ;;  %v481_v31 = vld [vmem:[#allocation7 + $0x8] sm:$0xff] }
 0x10d   :  { %v291_v51 = vpop.f32.mrf.mxu0  ;;  %v355_v52 = vpop.f32.mrf.mxu1 }
 0x10e   :  { %v292_v53 = vadd.f32 %v291_v51, %v1476_v43  ;;  %v418_v54 = vmax.f32 %v300_v49, 0.0  ;;  %v356_v32 = vadd.f32 %v355_v52, %v1476_v43 }
 0x10f   :  { %v1159_v55 = vpop.f32.mrf.mxu0  ;;  %v1484_v56 = vpop.f32.mrf.mxu1 }
 0x110   :  { %v416_v58 = vmax.f32 %v292_v53, 0.0  ;;  %v448_v63 = vpack.c.bf16 %v418_v54, %v417_v59  ;;  %v313_v4 = vadd.f32 %v1159_v55, %v1476_v43  ;;  %v432_v46 = vmax.f32 %v356_v32, 0.0 }
 0x111   :  { %v304_v60 = vpop.f32.mrf.mxu0  ;;  %v368_v61 = vpop.f32.mrf.mxu1  ;;  %v364_v59 = vadd.f32 %v1478_v47, %v1476_v43 }
 0x112   :  { %v447_v62 = vpack.c.bf16 %v416_v58, %v415_v57  ;;  %v305_v2 = vadd.f32 %v304_v60, %v1476_v43  ;;  %v421_v12 = vmax.f32 %v313_v4, 0.0  ;;  %v455_v53 = vpack.c.bf16 %v432_v46, %v431_v41 }
 0x113   :  { %v1160_v0 = vpop.f32.mrf.mxu0  ;;  %v1486_v1 = vpop.f32.mrf.mxu1  ;;  %v369_v54 = vadd.f32 %v368_v61, %v1476_v43  ;;  %v361_v57 = vadd.f32 %v1473_v42, %v1476_v43  ;;  %v377_v42 = vadd.f32 %v1484_v56, %v1476_v43 }
 0x114   :  { %v316_v3 = vadd.f32 %v1160_v0, %v1476_v43  ;;  %1201 = vmatprep.mubr.bf16.mxu1 %v447_v62  ;;  %v419_v10 = vmax.f32 %v305_v2, 0.0  ;;  %v434_v2 = vmax.f32 %v364_v59, 0.0  ;;  %v380_v47 = vadd.f32 %v1486_v1, %v1476_v43 }
 0x115   :  { %v307_v5 = vpop.f32.mrf.mxu0  ;;  %1202 = vmatmul.mubr.bf16.vlgmr.msra.gmra.mxu1 %v448_v63  ;;  %v371_v9 = vpop.f32.mrf.mxu1  ;;  %v435_v62 = vmax.f32 %v369_v54, 0.0  ;;  %v433_v0 = vmax.f32 %v361_v57, 0.0 }
 0x116   :  { %v308_v6 = vadd.f32 %v307_v5, %v1476_v43  ;;  %v422_v7 = vmax.f32 %v316_v3, 0.0  ;;  %v372_v55 = vadd.f32 %v371_v9, %v1476_v43 }
 0x117   :  { %v1163_v8 = vpop.f32.mrf.mxu0  ;;  %v1492_v17 = vpop.f32.mrf.mxu1 }
 0x118   :  { %v420_v11 = vmax.f32 %v308_v6, 0.0  ;;  %v450_v15 = vpack.c.bf16 %v422_v7, %v421_v12  ;;  %v329_v20 = vadd.f32 %v1163_v8, %v1476_v43  ;;  %v436_v63 = vmax.f32 %v372_v55, 0.0 }
 0x119   :  { %v320_v13 = vpop.f32.mrf.mxu0  ;;  %v384_v25 = vpop.f32.mrf.mxu1  ;;  %v456_v6 = vpack.c.bf16 %v434_v2, %v433_v0  ;;  %v393_v56 = vadd.f32 %v1492_v17, %v1476_v43  ;;  %v1342_v17 = vld [vmem:[#allocation5 + $0x90] sm:$0xff]  }
 0x11a   :  { %v449_v14 = vpack.c.bf16 %v420_v11, %v419_v10  ;;  %v321_v18 = vadd.f32 %v320_v13, %v1476_v43  ;;  %v425_v28 = vmax.f32 %v329_v20, 0.0  ;;  %v457_v4 = vpack.c.bf16 %v436_v63, %v435_v62  ;;  %1243 = vmatprep.subr.bf16.mxu0 %v1342_v17 }
 0x11b   :  { %v1164_v16 = vpop.f32.mrf.mxu0  ;;  %v1180_v35 = vpop.f32.mrf.mxu1  ;;  %v385_v61 = vadd.f32 %v384_v25, %v1476_v43  ;;  %v437_v10 = vmax.f32 %v377_v42, 0.0  ;;  %v438_v11 = vmax.f32 %v380_v47, 0.0  ;;  %v441_v20 = vmax.f32 %v393_v56, 0.0  ;;  %1244 = vmatpush3.bf16.msra.mxu0 %v1342_v17 }
 0x11c   :  { %v332_v19 = vadd.f32 %v1164_v16, %v1476_v43  ;;  %1205 = vmatprep.mubr.bf16.mxu1 %v449_v14  ;;  %v423_v26 = vmax.f32 %v321_v18, 0.0  ;;  %v396_v18 = vadd.f32 %v1180_v35, %v1476_v43 }
 0x11d   :  { %v323_v21 = vpop.f32.mrf.mxu0  ;;  %1206 = vmatmul.mubr.bf16.gmra.mxu1 %v450_v15  ;;  %v387_v45 = vpop.f32.mrf.mxu1  ;;  %v439_v8 = vmax.f32 %v385_v61, 0.0  ;;  %v458_v16 = vpack.c.bf16 %v438_v11, %v437_v10 }
 0x11e   :  { %v324_v22 = vadd.f32 %v323_v21, %v1476_v43  ;;  %v426_v23 = vmax.f32 %v332_v19, 0.0  ;;  %v388_v5 = vadd.f32 %v387_v45, %v1476_v43  ;;  %v442_v21 = vmax.f32 %v396_v18, 0.0 }
 0x11f   :  { %v1167_v24 = vpop.f32.mrf.mxu0  ;;  %v1183_v60 = vpop.f32.mrf.mxu1 }
 0x120   :  { %v424_v27 = vmax.f32 %v324_v22, 0.0  ;;  %v452_v33 = vpack.c.bf16 %v426_v23, %v425_v28  ;;  %v345_v38 = vadd.f32 %v1167_v24, %v1476_v43  ;;  %v440_v9 = vmax.f32 %v388_v5, 0.0 }
 0x121   :  { %v336_v29 = vpop.f32.mrf.mxu0  ;;  %v400_v3 = vpop.f32.mrf.mxu1  ;;  %v460_v23 = vpack.c.bf16 %v442_v21, %v441_v20  ;;  %v409_v24 = vadd.f32 %v1183_v60, %v1476_v43 }
 0x122   :  { %v451_v30 = vpack.c.bf16 %v424_v27, %v423_v26  ;;  %v337_v36 = vadd.f32 %v336_v29, %v1476_v43  ;;  %v429_v51 = vmax.f32 %v345_v38, 0.0  ;;  %v459_v13 = vpack.c.bf16 %v440_v9, %v439_v8  ;;  %v1343_v29 = vld [vmem:[#allocation5 + $0x88] sm:$0xff]  }
 0x123   :  { %v1168_v34 = vpop.f32.mrf.mxu0  ;;  %v1184_v7 = vpop.f32.mrf.mxu1  ;;  %v401_v14 = vadd.f32 %v400_v3, %v1476_v43  ;;  %v445_v26 = vmax.f32 %v409_v24, 0.0  ;;  %1245 = vmatprep.subr.bf16.mxu0 %v1343_v29 }
 0x124   :  { %v348_v37 = vadd.f32 %v1168_v34, %v1476_v43  ;;  %1209 = vmatprep.mubr.bf16.mxu1 %v451_v30  ;;  %v427_v49 = vmax.f32 %v337_v36, 0.0  ;;  %v412_v25 = vadd.f32 %v1184_v7, %v1476_v43  ;;  %1246 = vmatpush3.bf16.msra.mxu0 %v1343_v29  ;;  %v1344_v30 = vld [vmem:[#allocation5 + $0x80] sm:$0xff]  }
 0x125   :  { %v339_v40 = vpop.f32.mrf.mxu0  ;;  %1210 = vmatmul.mubr.bf16.gmra.mxu1 %v452_v33  ;;  %v403_v12 = vpop.f32.mrf.mxu1  ;;  %v443_v1 = vmax.f32 %v401_v14, 0.0  ;;  %1247 = vmatprep.subr.bf16.mxu0 %v1344_v30  ;;  %v1524_v33 = vrot.slane %v481_v31, %v1471_v39 }
 0x126   :  { %v340_v44 = vadd.f32 %v339_v40, %v1476_v43  ;;  %v430_v48 = vmax.f32 %v348_v37, 0.0  ;;  %v404_v15 = vadd.f32 %v403_v12, %v1476_v43  ;;  %v446_v27 = vmax.f32 %v412_v25, 0.0 }
 0x128   :  { %v428_v50 = vmax.f32 %v340_v44, 0.0  ;;  %v454_v58 = vpack.c.bf16 %v430_v48, %v429_v51  ;;  %v444_v19 = vmax.f32 %v404_v15, 0.0  ;;  %v462_v28 = vpack.c.bf16 %v446_v27, %v445_v26  ;;  %1248 = vmatpush3.bf16.msra.mxu0 %v1344_v30 }
 0x12a   :  { %v453_v52 = vpack.c.bf16 %v428_v50, %v427_v49  ;;  %v461_v22 = vpack.c.bf16 %v444_v19, %v443_v1 }
 0x12c   :  { %1213 = vmatprep.mubr.bf16.mxu1 %v453_v52 }
 0x12d   :  { %1214 = vmatmul.mubr.bf16.gmra.mxu1 %v454_v58 }
 0x12e   :  { %1217 = vmatprep.mubr.bf16.mxu1 %v455_v53 }
 0x135   :  { %1218 = vmatmul.mubr.bf16.gmra.mxu1 %v456_v6 }
 0x136   :  { %1221 = vmatprep.mubr.bf16.mxu1 %v457_v4 }
 0x13d   :  { %1222 = vmatmul.mubr.bf16.gmra.mxu1 %v458_v16 }
 0x13e   :  { %1225 = vmatprep.mubr.bf16.mxu1 %v459_v13 }
 0x145   :  { %1226 = vmatmul.mubr.bf16.gmra.mxu1 %v460_v23 }
 0x146   :  { %1229 = vmatprep.mubr.bf16.mxu1 %v461_v22 }
 0x14d   :  { %1230 = vmatmul.mubr.bf16.gmra.mxu1 %v462_v28 }
 0x1d5   :  { %v1203_v32 = vpop.f32.mrf.mxu1 }
 0x1d6   :  { %v577_v37 = vadd.f32 %v1203_v32, %v1524_v33 }
 0x1d7   :  { %v568_v43 = vpop.f32.mrf.mxu1 }
 0x1d8   :  { %v569_v35 = vadd.f32 %v568_v43, %v1524_v33  ;;  %v697_v45 = vmax.f32 %v577_v37, 0.0 }
 0x1d9   :  { %v1204_v34 = vpop.f32.mrf.mxu1 }
 0x1da   :  { %v580_v36 = vadd.f32 %v1204_v34, %v1524_v33  ;;  %v695_v46 = vmax.f32 %v569_v35, 0.0 }
 0x1db   :  { %v571_v38 = vpop.f32.mrf.mxu1 }
 0x1dc   :  { %v572_v40 = vadd.f32 %v571_v38, %v1524_v33  ;;  %v698_v41 = vmax.f32 %v580_v36, 0.0 }
 0x1dd   :  { %v1207_v44 = vpop.f32.mrf.mxu1 }
 0x1de   :  { %v696_v48 = vmax.f32 %v572_v40, 0.0  ;;  %v728_v51 = vpack.c.bf16 %v698_v41, %v697_v45  ;;  %v593_v55 = vadd.f32 %v1207_v44, %v1524_v33 }
 0x1df   :  { %v584_v49 = vpop.f32.mrf.mxu1 }
 0x1e0   :  { %v727_v50 = vpack.c.bf16 %v696_v48, %v695_v46  ;;  %v585_v53 = vadd.f32 %v584_v49, %v1524_v33  ;;  %v701_v0 = vmax.f32 %v593_v55, 0.0 }
 0x1e1   :  { %v1208_v52 = vpop.f32.mrf.mxu1 }
 0x1e2   :  { %v596_v54 = vadd.f32 %v1208_v52, %v1524_v33  ;;  %1249 = vmatprep.mubr.bf16.mxu0 %v727_v50  ;;  %v699_v62 = vmax.f32 %v585_v53, 0.0 }
 0x1e3   :  { %v587_v57 = vpop.f32.mrf.mxu1  ;;  %1250 = vmatmul.mubr.bf16.vlgmr.msra.gmra.mxu0 %v728_v51 }
 0x1e4   :  { %v588_v58 = vadd.f32 %v587_v57, %v1524_v33  ;;  %v702_v59 = vmax.f32 %v596_v54, 0.0 }
 0x1e5   :  { %v1211_v60 = vpop.f32.mrf.mxu1 }
 0x1e6   :  { %v700_v63 = vmax.f32 %v588_v58, 0.0  ;;  %v730_v4 = vpack.c.bf16 %v702_v59, %v701_v0  ;;  %v609_v42 = vadd.f32 %v1211_v60, %v1524_v33 }
 0x1e7   :  { %v600_v2 = vpop.f32.mrf.mxu1 }
 0x1e8   :  { %v729_v3 = vpack.c.bf16 %v700_v63, %v699_v62  ;;  %v601_v5 = vadd.f32 %v600_v2, %v1524_v33  ;;  %v705_v12 = vmax.f32 %v609_v42, 0.0 }
 0x1e9   :  { %v1212_v61 = vpop.f32.mrf.mxu1 }
 0x1ea   :  { %v612_v6 = vadd.f32 %v1212_v61, %v1524_v33  ;;  %1253 = vmatprep.mubr.bf16.mxu0 %v729_v3  ;;  %v703_v10 = vmax.f32 %v601_v5, 0.0 }
 0x1eb   :  { %v603_v47 = vpop.f32.mrf.mxu1  ;;  %1254 = vmatmul.mubr.bf16.gmra.mxu0 %v730_v4 }
 0x1ec   :  { %v604_v7 = vadd.f32 %v603_v47, %v1524_v33  ;;  %v706_v8 = vmax.f32 %v612_v6, 0.0 }
 0x1ed   :  { %v1215_v9 = vpop.f32.mrf.mxu1 }
 0x1ee   :  { %v704_v11 = vmax.f32 %v604_v7, 0.0  ;;  %v732_v15 = vpack.c.bf16 %v706_v8, %v705_v12  ;;  %v625_v1 = vadd.f32 %v1215_v9, %v1524_v33 }
 0x1ef   :  { %v616_v13 = vpop.f32.mrf.mxu1 }
 0x1f0   :  { %v731_v14 = vpack.c.bf16 %v704_v11, %v703_v10  ;;  %v617_v56 = vadd.f32 %v616_v13, %v1524_v33  ;;  %v709_v25 = vmax.f32 %v625_v1, 0.0 }
 0x1f1   :  { %v1216_v16 = vpop.f32.mrf.mxu1 }
 0x1f2   :  { %v628_v18 = vadd.f32 %v1216_v16, %v1524_v33  ;;  %1257 = vmatprep.mubr.bf16.mxu0 %v731_v14  ;;  %v707_v23 = vmax.f32 %v617_v56, 0.0 }
 0x1f3   :  { %v619_v19 = vpop.f32.mrf.mxu1  ;;  %1258 = vmatmul.mubr.bf16.gmra.mxu0 %v732_v15 }
 0x1f4   :  { %v620_v20 = vadd.f32 %v619_v19, %v1524_v33  ;;  %v710_v21 = vmax.f32 %v628_v18, 0.0 }
 0x1f5   :  { %v1219_v22 = vpop.f32.mrf.mxu1 }
 0x1f6   :  { %v708_v24 = vmax.f32 %v620_v20, 0.0  ;;  %v734_v28 = vpack.c.bf16 %v710_v21, %v709_v25  ;;  %v641_v31 = vadd.f32 %v1219_v22, %v1524_v33  ;;  %v761_v21 = vld [vmem:[#allocation7 + $0x10] sm:$0xff] }
 0x1f7   :  { %v632_v26 = vpop.f32.mrf.mxu1  ;;  %v1559_v22 = vrot.slane %v761_v21, %v1471_v39 }
 0x1f8   :  { %v733_v27 = vpack.c.bf16 %v708_v24, %v707_v23  ;;  %v633_v29 = vadd.f32 %v632_v26, %v1524_v33  ;;  %v713_v38 = vmax.f32 %v641_v31, 0.0 }
 0x1f9   :  { %v1220_v17 = vpop.f32.mrf.mxu1 }
 0x1fa   :  { %v644_v30 = vadd.f32 %v1220_v17, %v1524_v33  ;;  %1261 = vmatprep.mubr.bf16.mxu0 %v733_v27  ;;  %v711_v36 = vmax.f32 %v633_v29, 0.0 }
 0x1fb   :  { %v635_v32 = vpop.f32.mrf.mxu1  ;;  %1262 = vmatmul.mubr.bf16.gmra.mxu0 %v734_v28 }
 0x1fc   :  { %v636_v43 = vadd.f32 %v635_v32, %v1524_v33  ;;  %v714_v34 = vmax.f32 %v644_v30, 0.0 }
 0x1fd   :  { %v1223_v35 = vpop.f32.mrf.mxu1 }
 0x1fe   :  { %v712_v37 = vmax.f32 %v636_v43, 0.0  ;;  %v736_v44 = vpack.c.bf16 %v714_v34, %v713_v38  ;;  %v657_v49 = vadd.f32 %v1223_v35, %v1524_v33 }
 0x1ff   :  { %v648_v40 = vpop.f32.mrf.mxu1 }
 0x200   :  { %v735_v41 = vpack.c.bf16 %v712_v37, %v711_v36  ;;  %v649_v48 = vadd.f32 %v648_v40, %v1524_v33  ;;  %v717_v57 = vmax.f32 %v657_v49, 0.0 }
 0x201   :  { %v1224_v46 = vpop.f32.mrf.mxu1 }
 0x202   :  { %v660_v45 = vadd.f32 %v1224_v46, %v1524_v33  ;;  %1265 = vmatprep.mubr.bf16.mxu0 %v735_v41  ;;  %v715_v54 = vmax.f32 %v649_v48, 0.0 }
 0x203   :  { %v651_v50 = vpop.f32.mrf.mxu1  ;;  %1266 = vmatmul.mubr.bf16.gmra.mxu0 %v736_v44 }
 0x204   :  { %v652_v51 = vadd.f32 %v651_v50, %v1524_v33  ;;  %v718_v52 = vmax.f32 %v660_v45, 0.0 }
 0x205   :  { %v1227_v53 = vpop.f32.mrf.mxu1 }
 0x206   :  { %v716_v55 = vmax.f32 %v652_v51, 0.0  ;;  %v738_v60 = vpack.c.bf16 %v718_v52, %v717_v57  ;;  %v673_v2 = vadd.f32 %v1227_v53, %v1524_v33 }
 0x207   :  { %v664_v58 = vpop.f32.mrf.mxu1 }
 0x208   :  { %v737_v59 = vpack.c.bf16 %v716_v55, %v715_v54  ;;  %v665_v63 = vadd.f32 %v664_v58, %v1524_v33  ;;  %v721_v47 = vmax.f32 %v673_v2, 0.0 }
 0x209   :  { %v1228_v62 = vpop.f32.mrf.mxu1 }
 0x20a   :  { %v676_v0 = vadd.f32 %v1228_v62, %v1524_v33  ;;  %1269 = vmatprep.mubr.bf16.mxu0 %v737_v59  ;;  %v719_v6 = vmax.f32 %v665_v63, 0.0 }
 0x20b   :  { %v667_v3 = vpop.f32.mrf.mxu1  ;;  %1270 = vmatmul.mubr.bf16.gmra.mxu0 %v738_v60 }
 0x20c   :  { %v668_v4 = vadd.f32 %v667_v3, %v1524_v33  ;;  %v722_v61 = vmax.f32 %v676_v0, 0.0 }
 0x20d   :  { %v1231_v5 = vpop.f32.mrf.mxu1 }
 0x20e   :  { %v720_v42 = vmax.f32 %v668_v4, 0.0  ;;  %v740_v9 = vpack.c.bf16 %v722_v61, %v721_v47  ;;  %v689_v13 = vadd.f32 %v1231_v5, %v1524_v33 }
 0x20f   :  { %v680_v7 = vpop.f32.mrf.mxu1 }
 0x210   :  { %v739_v8 = vpack.c.bf16 %v720_v42, %v719_v6  ;;  %v681_v11 = vadd.f32 %v680_v7, %v1524_v33  ;;  %v725_v1 = vmax.f32 %v689_v13, 0.0 }
 0x211   :  { %v1232_v10 = vpop.f32.mrf.mxu1 }
 0x212   :  { %v692_v12 = vadd.f32 %v1232_v10, %v1524_v33  ;;  %1273 = vmatprep.mubr.bf16.mxu0 %v739_v8  ;;  %v723_v56 = vmax.f32 %v681_v11, 0.0 }
 0x213   :  { %v683_v14 = vpop.f32.mrf.mxu1  ;;  %1274 = vmatmul.mubr.bf16.gmra.mxu0 %v740_v9 }
 0x214   :  { %v684_v15 = vadd.f32 %v683_v14, %v1524_v33  ;;  %v726_v16 = vmax.f32 %v692_v12, 0.0 }
 0x216   :  { %v724_v18 = vmax.f32 %v684_v15, 0.0  ;;  %v742_v20 = vpack.c.bf16 %v726_v16, %v725_v1 }
 0x218   :  { %v741_v19 = vpack.c.bf16 %v724_v18, %v723_v56 }
 0x21a   :  { %1277 = vmatprep.mubr.bf16.mxu0 %v741_v19 }
 0x21b   :  { %1278 = vmatmul.mubr.bf16.gmra.mxu0 %v742_v20 }
 0x2a3   :  { %v1251_v23 = vpop.f32.mrf.mxu0 }
 0x2a4   :  { %v857_v24 = vadd.f32 %v1251_v23, %v1559_v22 }
 0x2a5   :  { %v848_v25 = vpop.f32.mrf.mxu0 }
 0x2a6   :  { %977 = vst [vmem:[#allocation8 + $0x10] sm:$0xff] %v857_v24  ;;  %v849_v26 = vadd.f32 %v848_v25, %v1559_v22 }
 0x2a7   :  { %v1252_v33 = vpop.f32.mrf.mxu0 }
 0x2a8   :  { %975 = vst [vmem:[#allocation8] sm:$0xff] %v849_v26  ;;  %v860_v27 = vadd.f32 %v1252_v33, %v1559_v22 }
 0x2a9   :  { %v851_v28 = vpop.f32.mrf.mxu0 }
 0x2aa   :  { %978 = vst [vmem:[#allocation8 + $0x18] sm:$0xff] %v860_v27  ;;  %v852_v17 = vadd.f32 %v851_v28, %v1559_v22 }
 0x2ab   :  { %v1255_v29 = vpop.f32.mrf.mxu0 }
 0x2ac   :  { %976 = vst [vmem:[#allocation8 + $0x8] sm:$0xff] %v852_v17  ;;  %v873_v39 = vadd.f32 %v1255_v29, %v1559_v22 }
 0x2ad   :  { %v864_v30 = vpop.f32.mrf.mxu0 }
 0x2ae   :  { %981 = vst [vmem:[#allocation8 + $0x30] sm:$0xff] %v873_v39  ;;  %v865_v31 = vadd.f32 %v864_v30, %v1559_v22 }
 0x2af   :  { %v1256_v32 = vpop.f32.mrf.mxu0 }
 0x2b0   :  { %979 = vst [vmem:[#allocation8 + $0x20] sm:$0xff] %v865_v31  ;;  %v876_v43 = vadd.f32 %v1256_v32, %v1559_v22 }
 0x2b1   :  { %v867_v34 = vpop.f32.mrf.mxu0 }
 0x2b2   :  { %982 = vst [vmem:[#allocation8 + $0x38] sm:$0xff] %v876_v43  ;;  %v868_v35 = vadd.f32 %v867_v34, %v1559_v22 }
 0x2b3   :  { %v1259_v36 = vpop.f32.mrf.mxu0 }
 0x2b4   :  { %980 = vst [vmem:[#allocation8 + $0x28] sm:$0xff] %v868_v35  ;;  %v889_v37 = vadd.f32 %v1259_v36, %v1559_v22 }
 0x2b5   :  { %v880_v38 = vpop.f32.mrf.mxu0 }
 0x2b6   :  { %985 = vst [vmem:[#allocation8 + $0x50] sm:$0xff] %v889_v37  ;;  %v881_v40 = vadd.f32 %v880_v38, %v1559_v22 }
 0x2b7   :  { %v1260_v41 = vpop.f32.mrf.mxu0 }
 0x2b8   :  { %983 = vst [vmem:[#allocation8 + $0x40] sm:$0xff] %v881_v40  ;;  %v892_v44 = vadd.f32 %v1260_v41, %v1559_v22 }
 0x2b9   :  { %v883_v46 = vpop.f32.mrf.mxu0 }
 0x2ba   :  { %986 = vst [vmem:[#allocation8 + $0x58] sm:$0xff] %v892_v44  ;;  %v884_v48 = vadd.f32 %v883_v46, %v1559_v22 }
 0x2bb   :  { %v1263_v45 = vpop.f32.mrf.mxu0 }
 0x2bc   :  { %984 = vst [vmem:[#allocation8 + $0x48] sm:$0xff] %v884_v48  ;;  %v905_v49 = vadd.f32 %v1263_v45, %v1559_v22 }
 0x2bd   :  { %v896_v50 = vpop.f32.mrf.mxu0 }
 0x2be   :  { %989 = vst [vmem:[#allocation8 + $0x70] sm:$0xff] %v905_v49  ;;  %v897_v51 = vadd.f32 %v896_v50, %v1559_v22 }
 0x2bf   :  { %v1264_v52 = vpop.f32.mrf.mxu0 }
 0x2c0   :  { %987 = vst [vmem:[#allocation8 + $0x60] sm:$0xff] %v897_v51  ;;  %v908_v53 = vadd.f32 %v1264_v52, %v1559_v22 }
 0x2c1   :  { %v899_v54 = vpop.f32.mrf.mxu0 }
 0x2c2   :  { %990 = vst [vmem:[#allocation8 + $0x78] sm:$0xff] %v908_v53  ;;  %v900_v55 = vadd.f32 %v899_v54, %v1559_v22 }
 0x2c3   :  { %v1267_v57 = vpop.f32.mrf.mxu0 }
 0x2c4   :  { %988 = vst [vmem:[#allocation8 + $0x68] sm:$0xff] %v900_v55  ;;  %v921_v58 = vadd.f32 %v1267_v57, %v1559_v22 }
 0x2c5   :  { %v912_v59 = vpop.f32.mrf.mxu0 }
 0x2c6   :  { %993 = vst [vmem:[#allocation8 + $0x90] sm:$0xff] %v921_v58  ;;  %v913_v60 = vadd.f32 %v912_v59, %v1559_v22 }
 0x2c7   :  { %v1268_v62 = vpop.f32.mrf.mxu0 }
 0x2c8   :  { %991 = vst [vmem:[#allocation8 + $0x80] sm:$0xff] %v913_v60  ;;  %v924_v63 = vadd.f32 %v1268_v62, %v1559_v22 }
 0x2c9   :  { %v915_v0 = vpop.f32.mrf.mxu0 }
 0x2ca   :  { %994 = vst [vmem:[#allocation8 + $0x98] sm:$0xff] %v924_v63  ;;  %v916_v2 = vadd.f32 %v915_v0, %v1559_v22 }
 0x2cb   :  { %v1271_v3 = vpop.f32.mrf.mxu0 }
 0x2cc   :  { %992 = vst [vmem:[#allocation8 + $0x88] sm:$0xff] %v916_v2  ;;  %v937_v4 = vadd.f32 %v1271_v3, %v1559_v22 }
 0x2cd   :  { %v928_v61 = vpop.f32.mrf.mxu0 }
 0x2ce   :  { %997 = vst [vmem:[#allocation8 + $0xb0] sm:$0xff] %v937_v4  ;;  %v929_v5 = vadd.f32 %v928_v61, %v1559_v22 }
 0x2cf   :  { %v1272_v6 = vpop.f32.mrf.mxu0 }
 0x2d0   :  { %995 = vst [vmem:[#allocation8 + $0xa0] sm:$0xff] %v929_v5  ;;  %v940_v42 = vadd.f32 %v1272_v6, %v1559_v22 }
 0x2d1   :  { %v931_v47 = vpop.f32.mrf.mxu0 }
 0x2d2   :  { %998 = vst [vmem:[#allocation8 + $0xb8] sm:$0xff] %v940_v42  ;;  %v932_v7 = vadd.f32 %v931_v47, %v1559_v22 }
 0x2d3   :  { %v1275_v8 = vpop.f32.mrf.mxu0 }
 0x2d4   :  { %996 = vst [vmem:[#allocation8 + $0xa8] sm:$0xff] %v932_v7  ;;  %v953_v9 = vadd.f32 %v1275_v8, %v1559_v22 }
 0x2d5   :  { %v944_v10 = vpop.f32.mrf.mxu0 }
 0x2d6   :  { %1001 = vst [vmem:[#allocation8 + $0xd0] sm:$0xff] %v953_v9  ;;  %v945_v11 = vadd.f32 %v944_v10, %v1559_v22 }
 0x2d7   :  { %v1276_v12 = vpop.f32.mrf.mxu0 }
 0x2d8   :  { %999 = vst [vmem:[#allocation8 + $0xc0] sm:$0xff] %v945_v11  ;;  %v956_v13 = vadd.f32 %v1276_v12, %v1559_v22 }
 0x2d9   :  { %v947_v14 = vpop.f32.mrf.mxu0 }
 0x2da   :  { %1002 = vst [vmem:[#allocation8 + $0xd8] sm:$0xff] %v956_v13  ;;  %v948_v15 = vadd.f32 %v947_v14, %v1559_v22 }
 0x2db   :  { %v1279_v16 = vpop.f32.mrf.mxu0 }
 0x2dc   :  { %1000 = vst [vmem:[#allocation8 + $0xc8] sm:$0xff] %v948_v15  ;;  %v969_v56 = vadd.f32 %v1279_v16, %v1559_v22 }
 0x2dd   :  { %v960_v18 = vpop.f32.mrf.mxu0 }
 0x2de   :  { %1005 = vst [vmem:[#allocation8 + $0xf0] sm:$0xff] %v969_v56  ;;  %v961_v1 = vadd.f32 %v960_v18, %v1559_v22 }
 0x2df   :  { %v1280_v19 = vpop.f32.mrf.mxu0 }
 0x2e0   :  { %1003 = vst [vmem:[#allocation8 + $0xe0] sm:$0xff] %v961_v1  ;;  %v972_v20 = vadd.f32 %v1280_v19, %v1559_v22 }
 0x2e1   :  { %v963_v21 = vpop.f32.mrf.mxu0 }
 0x2e2   :  { %1006 = vst [vmem:[#allocation8 + $0xf8] sm:$0xff] %v972_v20  ;;  %v964_v23 = vadd.f32 %v963_v21, %v1559_v22 }
 0x2e4   :  { %1004 = vst [vmem:[#allocation8 + $0xe8] sm:$0xff] %v964_v23 }
 0x2e5   :  { %1416 = shalt.err (!%p1413_p5)
}
 0x2e6   :  { %1018 = dma.vmem_to_hbm [thread:$0]  %s1013_s2, 4096, %s1602_s3, [#allocation4], %s1436_s1, %s1436_s1, %s1437_s27  }
 0x2e7   :  { %1429 = dma.done.wait [#allocation4], 4096  }
 0x2e8   :  { %1430 = vsyncadd [#allocation4], 4294963200 }
 0x2e9   :  { %1022 = vsyncpa [#allocation3], 1 }
 0x2ea   :  { %1023 = vsyncpa [#allocation6], 1 }
 0x2eb   :  { %1024 = vsyncpa [#allocation4], 1 }

</bundles_post_ra>
